<compile_context>
chip_gen: v7x
topology: tpu7x:2x2x1
jax: 0.10.0
libtpu: 0.0.40
codegen_flags: <defaults>
</compile_context>

<pallas_src>
import functools
import math

import jax
import jax.numpy as jnp
from jax import lax
from jax.experimental import pallas as pl
from jax.experimental.pallas import tpu as pltpu


def _decode_spm_kernel(xh_ref, xf_ref, *refs, S, num_kp, conf_threshold,
                       dist2_int, pred, max_det):
    """Fused SPM decode.

    Inputs:
      xh_ref: [nstack, S, S]     channel-0 (heatmap) view, 2-D spatial (for NMS).
      xf_ref: [nstack, C, S*S]   full tensor, spatially flattened (lane-dense).
    Outputs pred=True : heat [1,S*S], disp [2K,S*S], det [2,max_det], cnt [1], kp [2K,max_det]
    Outputs pred=False: det, cnt, kp
    Scratch: conf [S,S] f32 VMEM, loc [max_det] i32 SMEM (packed y<<16|x).
    """
    if pred:
        heat_ref, disp_ref, det_ref, cnt_ref, kp_ref, conf_ref, loc_ref = refs
    else:
        det_ref, cnt_ref, kp_ref, conf_ref, loc_ref = refs

    SS = S * S
    NEG = -1e30
    INT_SENTINEL = 2147483647  # > any packed (y<<16)|x key for S <= 32768

    # ---- stage 1: mean over nstack + sigmoid / tanh, stored lane-dense ----
    if pred:
        m = jnp.mean(xf_ref[...], axis=0)                       # [C, S*S]
        heat_ref[...] = 1.0 / (1.0 + jnp.exp(-m[0:1, :]))       # sigmoid
        disp_ref[...] = jnp.tanh(m[1:, :])
        conf2d = 1.0 / (1.0 + jnp.exp(-jnp.mean(xh_ref[...], axis=0)))   # [S, S]
    else:
        conf2d = xh_ref[0]                                      # raw target heatmap

    # threshold once: cells <= conf_threshold (or suppressed later) hold NEG
    conf_ref[...] = jnp.where(conf2d > conf_threshold, conf2d, NEG)

    for j in range(max_det):            # deterministic scratch init (scalar stores)
        loc_ref[j] = 0
    cnt_ref[0] = 0

    # hoisted loop invariants
    yi2 = lax.broadcasted_iota(jnp.int32, (S, S), 0)
    xi2 = lax.broadcasted_iota(jnp.int32, (S, S), 1)
    key_map = (yi2 << 16) | xi2         # packed (y, x); min == row-major-first argmax

    # ---- greedy NMS: scalar bookkeeping only; heavy gather is deferred ----
    @pl.loop(0, max_det)
    def _nms(i):
        @pl.when(cnt_ref[0] == i)       # once a round found nothing, do no more work
        def _round():
            conf = conf_ref[...]
            mx = jnp.max(conf)

            @pl.when(mx > conf_threshold)
            def _record():
                # argmax with smallest row-major index on ties (single min reduction)
                key = jnp.min(jnp.where(conf >= mx, key_map, INT_SENTINEL))
                cy = key >> 16
                cx = key & 0xFFFF
                loc_ref[i] = key
                cnt_ref[0] = i + 1
                # suppress everything within dist_threshold (int32 test, no cast)
                d2 = (xi2 - cx) * (xi2 - cx) + (yi2 - cy) * (yi2 - cy)
                conf_ref[...] = jnp.where(d2 > dist2_int, conf, NEG)

    count = cnt_ref[0]

    # ---- batched displacement gather: one one-hot matmul on the (idle) MXU ----
    lane_det = lax.broadcasted_iota(jnp.int32, (1, max_det), 1)
    key_row = jnp.zeros((1, max_det), jnp.int32)
    for j in range(max_det):            # scatter SMEM scalars into a lane vector
        key_row = jnp.where(lane_det == j, loc_ref[j], key_row)
    cy_row = key_row >> 16
    cx_row = key_row & 0xFFFF
    flat_row = cy_row * S + cx_row                                   # [1, max_det]

    sp_iota = lax.broadcasted_iota(jnp.int32, (SS, max_det), 0)
    onehot = (sp_iota == flat_row).astype(jnp.float32)               # [S*S, max_det]

    if pred:
        dmat = disp_ref[...]                                         # [2K, S*S]
    else:
        dmat = xf_ref[0, pl.ds(1, 2 * num_kp), :]                    # [2K, S*S]

    g_d = jnp.dot(dmat, onehot, preferred_element_type=jnp.float32)  # [2K, max_det]

    cx_f = cx_row.astype(jnp.float32)
    cy_f = cy_row.astype(jnp.float32)

    par = lax.broadcasted_iota(jnp.int32, (2 * num_kp, max_det), 0)
    offs = jnp.where((par & 1) == 0, cx_f, cy_f)                     # [2K, max_det]
    kp_mask = lax.broadcasted_iota(jnp.int32, (2 * num_kp, max_det), 1) < count
    kp_ref[...] = jnp.where(kp_mask, g_d * float(S) + offs, 0.0)

    which = lax.broadcasted_iota(jnp.int32, (2, max_det), 0)
    det_mask = lax.broadcasted_iota(jnp.int32, (2, max_det), 1) < count
    det_ref[...] = jnp.where(det_mask, jnp.where(which == 0, cx_f, cy_f), 0.0)


def make_decode_spm(input_size, sigma, conf_threshold, pred=True, max_det=8):
    dist_threshold = (6 * sigma + 2) / 2
    # integer d2 test: d2 > floor(dist^2)  <=>  d > dist_threshold  (d2 is int)
    dist2_int = int(math.floor(dist_threshold * dist_threshold))

    def decode(x):
        # x: [1, nstack, 1+2K, S, S] if pred else [1, 1+2K, S, S]
        assert x.shape[0] == 1
        xk = x[0] if pred else x[0][None]        # [nstack, C, S, S]
        nstack, C, S, _ = xk.shape
        num_kp = (C - 1) // 2
        SS = S * S

        xh = xk[:, 0, :, :]                      # [nstack, S, S]   (2-D heat view)
        xf = xk.reshape(nstack, C, SS)           # [nstack, C, S*S] (lane-dense)

        kern = functools.partial(
            _decode_spm_kernel, S=S, num_kp=num_kp,
            conf_threshold=float(conf_threshold),
            dist2_int=dist2_int, pred=pred, max_det=max_det)

        vmem = pl.BlockSpec(memory_space=pltpu.MemorySpace.VMEM)
        smem = pl.BlockSpec(memory_space=pltpu.MemorySpace.SMEM)

        det_shapes = (
            jax.ShapeDtypeStruct((2, max_det), jnp.float32),          # root (x; y) per det
            jax.ShapeDtypeStruct((1,), jnp.int32),                    # num detections
            jax.ShapeDtypeStruct((2 * num_kp, max_det), jnp.float32), # kpts (grid units)
        )
        det_specs = (vmem, smem, vmem)
        if pred:
            out_shapes = (
                jax.ShapeDtypeStruct((1, SS), jnp.float32),           # sigmoid heatmap
                jax.ShapeDtypeStruct((2 * num_kp, SS), jnp.float32),  # tanh displacements
            ) + det_shapes
            out_specs = (vmem, vmem) + det_specs
        else:
            out_shapes = det_shapes
            out_specs = det_specs

        scratch = [pltpu.VMEM((S, S), jnp.float32),    # working confidence map for NMS
                   pltpu.SMEM((max_det,), jnp.int32)]  # packed (y<<16|x) per detection

        need = 4 * (xh.size + xf.size + (C * SS if pred else 0)
                    + SS + SS * max_det + 4 * max_det * (2 * num_kp + 4))
        vmem_limit = int(min(max(32 * 1024 * 1024, 2 * need), 96 * 1024 * 1024))

        outs = pl.pallas_call(
            kern,
            out_shape=out_shapes,
            in_specs=[vmem, vmem],
            out_specs=out_specs,
            scratch_shapes=scratch,
            compiler_params=pltpu.CompilerParams(vmem_limit_bytes=vmem_limit),
        )(xh, xf)

        if pred:
            heat_flat, disp_flat, det, cnt, kp = outs
            heat = heat_flat.reshape(1, S, S)
            disp = disp_flat.reshape(2 * num_kp, S, S)
        else:
            det, cnt, kp = outs
            heat = xk[0, 0:1, :, :]              # targets: plain slices, no kernel copy
            disp = xk[0, 1:, :, :]

        scale = float(input_size) / float(S)
        root_joints = det.T * scale                                   # [max_det, 2]
        keypoints = kp.T.reshape(max_det, num_kp, 2) * scale          # [max_det, K, 2]
        return root_joints, keypoints, cnt[0], heat, disp

    return decode


if __name__ == "__main__":
    key = jax.random.PRNGKey(0)
    batch, nstack, K, S = 1, 2, 4, 16
    input_size, sigma, conf_threshold = 64, 2, 0.8
    scale = input_size / S

    kx, kh, kd = jax.random.split(key, 3)
    # scale logits so some sigmoid values exceed the confidence threshold
    x = jax.random.normal(kx, (batch, nstack, 1 + 2 * K, S, S), jnp.float32) * 3.0

    decode = make_decode_spm(input_size, sigma, conf_threshold, pred=True, max_det=8)
    root_joints, keypoints, count, heat, disp = decode(x)
    jax.block_until_ready((root_joints, keypoints, count, heat, disp))

    n = int(count)
    rj = root_joints[:n]
    kp = keypoints[:n]
    assert rj.shape == (n, 2) and kp.shape == (n, K, 2)
    assert heat.shape == (1, S, S) and disp.shape == (2 * K, S, S)
    assert bool(jnp.all(jnp.isfinite(rj))) and bool(jnp.all(jnp.isfinite(kp)))

    # numerical checks against a pure-JAX reference for stage 1
    m_ref = jnp.mean(x[0], axis=0)
    assert bool(jnp.allclose(heat, jax.nn.sigmoid(m_ref[0:1]), atol=1e-5))
    assert bool(jnp.allclose(disp, jnp.tanh(m_ref[1:]), atol=1e-5))

    # NMS / keypoint sanity checks
    if n > 0:
        g = jnp.round(rj / scale).astype(jnp.int32)          # grid (x, y)
        hv = heat[0][g[:, 1], g[:, 0]]
        assert bool(jnp.all(hv > conf_threshold))
        x0, y0 = int(g[0, 0]), int(g[0, 1])
        exp_kp_x = (float(disp[0, y0, x0]) * S + x0) * scale
        assert abs(float(kp[0, 0, 0]) - exp_kp_x) < 1e-3

    # pred=False (targets) path: heat channel already in probability space
    heat_t = jax.random.uniform(kh, (1, S, S), jnp.float32)
    disp_t = jax.random.uniform(kd, (2 * K, S, S), jnp.float32, minval=-1.0, maxval=1.0)
    xt = jnp.concatenate([heat_t, disp_t], axis=0)[None]     # [1, 1+2K, S, S]
    decode_t = make_decode_spm(input_size, sigma, conf_threshold, pred=False, max_det=8)
    rj_t, kp_t, cnt_t, heat_o, disp_o = decode_t(xt)
    jax.block_until_ready((rj_t, kp_t, cnt_t))
    assert heat_o.shape == (1, S, S) and disp_o.shape == (2 * K, S, S)
    assert bool(jnp.all(jnp.isfinite(rj_t))) and bool(jnp.all(jnp.isfinite(kp_t)))

    print("KERNEL_OK")
</pallas_src>

<mosaic_0001>
module attributes {stable_mosaic.version = 11 : i64} {
  func.func @_decode_spm_kernel(%arg0: memref<2x16x16xf32, #tpu.memory_space<vmem>>, %arg1: memref<2x9x256xf32, #tpu.memory_space<vmem>>, %arg2: memref<1x256xf32, #tpu.memory_space<vmem>>, %arg3: memref<8x256xf32, #tpu.memory_space<vmem>>, %arg4: memref<2x8xf32, #tpu.memory_space<vmem>>, %arg5: memref<1xi32, #tpu.memory_space<smem>>, %arg6: memref<8x8xf32, #tpu.memory_space<vmem>>, %arg7: memref<16x16xf32, #tpu.memory_space<vmem>>, %arg8: memref<8xi32, #tpu.memory_space<smem>>) attributes {dimension_semantics = [], scalar_prefetch = 0 : i64, scratch_operands = 2 : i64, tpu.core_type = #tpu.core_type<tc>} {
    %c0 = arith.constant 0 : index
    %c0_0 = arith.constant 0 : index
    %c0_1 = arith.constant 0 : index
    %0 = vector.load %arg1[%c0, %c0_0, %c0_1] : memref<2x9x256xf32, #tpu.memory_space<vmem>>, vector<2x9x256xf32>
    %cst = arith.constant dense<0.000000e+00> : vector<9x256xf32>
    %1 = vector.multi_reduction <add>, %0, %cst [0] : vector<2x9x256xf32> to vector<9x256xf32>
    %cst_2 = arith.constant 2.000000e+00 : f32
    %2 = vector.broadcast %cst_2 : f32 to vector<9x256xf32>
    %3 = arith.divf %1, %2 : vector<9x256xf32>
    %4 = vector.extract_strided_slice %3 {offsets = [0, 0], sizes = [1, 256], strides = [1, 1]} : vector<9x256xf32> to vector<1x256xf32>
    %cst_3 = arith.constant 0.000000e+00 : f32
    %5 = vector.broadcast %cst_3 : f32 to vector<1x256xf32>
    %6 = arith.subf %5, %4 : vector<1x256xf32>
    %7 = math.exp %6 : vector<1x256xf32>
    %cst_4 = arith.constant 1.000000e+00 : f32
    %8 = vector.broadcast %cst_4 : f32 to vector<1x256xf32>
    %9 = arith.addf %8, %7 : vector<1x256xf32>
    %cst_5 = arith.constant 1.000000e+00 : f32
    %10 = vector.broadcast %cst_5 : f32 to vector<1x256xf32>
    %11 = arith.divf %10, %9 : vector<1x256xf32>
    %c0_6 = arith.constant 0 : index
    %c0_7 = arith.constant 0 : index
    %12 = vector.load %arg2[%c0_6, %c0_7] : memref<1x256xf32, #tpu.memory_space<vmem>>, vector<1x256xf32>
    tpu.vector_store %arg2[%c0_6, %c0_7], %11 {strides = array<i32>} : memref<1x256xf32, #tpu.memory_space<vmem>>, vector<1x256xf32>,
    %13 = vector.extract_strided_slice %3 {offsets = [1, 0], sizes = [8, 256], strides = [1, 1]} : vector<9x256xf32> to vector<8x256xf32>
    %14 = math.tanh %13 : vector<8x256xf32>
    %c0_8 = arith.constant 0 : index
    %c0_9 = arith.constant 0 : index
    %15 = vector.load %arg3[%c0_8, %c0_9] : memref<8x256xf32, #tpu.memory_space<vmem>>, vector<8x256xf32>
    tpu.vector_store %arg3[%c0_8, %c0_9], %14 {strides = array<i32>} : memref<8x256xf32, #tpu.memory_space<vmem>>, vector<8x256xf32>,
    %c0_10 = arith.constant 0 : index
    %c0_11 = arith.constant 0 : index
    %c0_12 = arith.constant 0 : index
    %16 = vector.load %arg0[%c0_10, %c0_11, %c0_12] : memref<2x16x16xf32, #tpu.memory_space<vmem>>, vector<2x16x16xf32>
    %cst_13 = arith.constant dense<0.000000e+00> : vector<16x16xf32>
    %17 = vector.multi_reduction <add>, %16, %cst_13 [0] : vector<2x16x16xf32> to vector<16x16xf32>
    %cst_14 = arith.constant 2.000000e+00 : f32
    %18 = vector.broadcast %cst_14 : f32 to vector<16x16xf32>
    %19 = arith.divf %17, %18 : vector<16x16xf32>
    %cst_15 = arith.constant 0.000000e+00 : f32
    %20 = vector.broadcast %cst_15 : f32 to vector<16x16xf32>
    %21 = arith.subf %20, %19 : vector<16x16xf32>
    %22 = math.exp %21 : vector<16x16xf32>
    %cst_16 = arith.constant 1.000000e+00 : f32
    %23 = vector.broadcast %cst_16 : f32 to vector<16x16xf32>
    %24 = arith.addf %23, %22 : vector<16x16xf32>
    %cst_17 = arith.constant 1.000000e+00 : f32
    %25 = vector.broadcast %cst_17 : f32 to vector<16x16xf32>
    %26 = arith.divf %25, %24 : vector<16x16xf32>
    %cst_18 = arith.constant 8.000000e-01 : f32
    %27 = vector.broadcast %cst_18 : f32 to vector<16x16xf32>
    %28 = arith.cmpf ogt, %26, %27 : vector<16x16xf32>
    %cst_19 = arith.constant -1.000000e+30 : f32
    %29 = vector.broadcast %cst_19 : f32 to vector<16x16xf32>
    %30 = arith.select %28, %26, %29 : vector<16x16xi1>, vector<16x16xf32>
    %c0_20 = arith.constant 0 : index
    %c0_21 = arith.constant 0 : index
    %31 = vector.load %arg7[%c0_20, %c0_21] : memref<16x16xf32, #tpu.memory_space<vmem>>, vector<16x16xf32>
    tpu.vector_store %arg7[%c0_20, %c0_21], %30 {strides = array<i32>} : memref<16x16xf32, #tpu.memory_space<vmem>>, vector<16x16xf32>,
    %c0_i32 = arith.constant 0 : i32
    %c0_22 = arith.constant 0 : index
    %32 = memref.load %arg8[%c0_22] : memref<8xi32, #tpu.memory_space<smem>>
    memref.store %c0_i32, %arg8[%c0_22] : memref<8xi32, #tpu.memory_space<smem>>
    %c0_i32_23 = arith.constant 0 : i32
    %c1 = arith.constant 1 : index
    %33 = memref.load %arg8[%c1] : memref<8xi32, #tpu.memory_space<smem>>
    memref.store %c0_i32_23, %arg8[%c1] : memref<8xi32, #tpu.memory_space<smem>>
    %c0_i32_24 = arith.constant 0 : i32
    %c2 = arith.constant 2 : index
    %34 = memref.load %arg8[%c2] : memref<8xi32, #tpu.memory_space<smem>>
    memref.store %c0_i32_24, %arg8[%c2] : memref<8xi32, #tpu.memory_space<smem>>
    %c0_i32_25 = arith.constant 0 : i32
    %c3 = arith.constant 3 : index
    %35 = memref.load %arg8[%c3] : memref<8xi32, #tpu.memory_space<smem>>
    memref.store %c0_i32_25, %arg8[%c3] : memref<8xi32, #tpu.memory_space<smem>>
    %c0_i32_26 = arith.constant 0 : i32
    %c4 = arith.constant 4 : index
    %36 = memref.load %arg8[%c4] : memref<8xi32, #tpu.memory_space<smem>>
    memref.store %c0_i32_26, %arg8[%c4] : memref<8xi32, #tpu.memory_space<smem>>
    %c0_i32_27 = arith.constant 0 : i32
    %c5 = arith.constant 5 : index
    %37 = memref.load %arg8[%c5] : memref<8xi32, #tpu.memory_space<smem>>
    memref.store %c0_i32_27, %arg8[%c5] : memref<8xi32, #tpu.memory_space<smem>>
    %c0_i32_28 = arith.constant 0 : i32
    %c6 = arith.constant 6 : index
    %38 = memref.load %arg8[%c6] : memref<8xi32, #tpu.memory_space<smem>>
    memref.store %c0_i32_28, %arg8[%c6] : memref<8xi32, #tpu.memory_space<smem>>
    %c0_i32_29 = arith.constant 0 : i32
    %c7 = arith.constant 7 : index
    %39 = memref.load %arg8[%c7] : memref<8xi32, #tpu.memory_space<smem>>
    memref.store %c0_i32_29, %arg8[%c7] : memref<8xi32, #tpu.memory_space<smem>>
    %c0_i32_30 = arith.constant 0 : i32
    %c0_31 = arith.constant 0 : index
    %40 = memref.load %arg5[%c0_31] : memref<1xi32, #tpu.memory_space<smem>>
    memref.store %c0_i32_30, %arg5[%c0_31] : memref<1xi32, #tpu.memory_space<smem>>
    %41 = tpu.iota {dimensions = array<i32: 0>} : vector<16x16xi32>
    %42 = tpu.iota {dimensions = array<i32: 1>} : vector<16x16xi32>
    %c16_i32 = arith.constant 16 : i32
    %43 = vector.broadcast %c16_i32 : i32 to vector<16x16xi32>
    %44 = arith.shli %41, %43 : vector<16x16xi32>
    %45 = arith.ori %44, %42 : vector<16x16xi32>
    %c0_i32_32 = arith.constant 0 : i32
    %c8_i32 = arith.constant 8 : i32
    %46 = arith.addi %c0_i32_32, %c8_i32 : i32
    %c1_i32 = arith.constant 1 : i32
    scf.for %arg9 = %c0_i32_32 to %46 step %c1_i32  : i32 {
      %c1_i32_61 = arith.constant 1 : i32
      %139 = arith.muli %arg9, %c1_i32_61 : i32
      %c0_i32_62 = arith.constant 0 : i32
      %140 = arith.addi %c0_i32_62, %139 : i32
      %c0_63 = arith.constant 0 : index
      %141 = memref.load %arg5[%c0_63] : memref<1xi32, #tpu.memory_space<smem>>
      %142 = arith.cmpi eq, %141, %140 : i32
      %143 = arith.extui %142 : i1 to i32
      %c0_i32_64 = arith.constant 0 : i32
      %144 = arith.cmpi ne, %143, %c0_i32_64 : i32
      scf.if %144 {
        %c0_65 = arith.constant 0 : index
        %c0_66 = arith.constant 0 : index
        %145 = vector.load %arg7[%c0_65, %c0_66] : memref<16x16xf32, #tpu.memory_space<vmem>>, vector<16x16xf32>
        %146 = vector.shape_cast %145 : vector<16x16xf32> to vector<1x16x16xf32>
        %cst_67 = arith.constant dense<0xFF800000> : vector<1xf32>
        %147 = vector.multi_reduction <maximumf>, %146, %cst_67 [1, 2] : vector<1x16x16xf32> to vector<1xf32>
        %148 = vector.shape_cast %147 : vector<1xf32> to vector<1x1x1xf32>
        %149 = vector.extract %148[0, 0, 0] : f32 from vector<1x1x1xf32>
        %cst_68 = arith.constant 8.000000e-01 : f32
        %150 = arith.cmpf ogt, %149, %cst_68 : f32
        %151 = arith.extui %150 : i1 to i32
        %c0_i32_69 = arith.constant 0 : i32
        %152 = arith.cmpi ne, %151, %c0_i32_69 : i32
        scf.if %152 {
          %153 = vector.broadcast %149 : f32 to vector<16x16xf32>
          %154 = arith.cmpf oge, %145, %153 : vector<16x16xf32>
          %c2147483647_i32 = arith.constant 2147483647 : i32
          %155 = vector.broadcast %c2147483647_i32 : i32 to vector<16x16xi32>
          %156 = arith.select %154, %45, %155 : vector<16x16xi1>, vector<16x16xi32>
          %157 = vector.shape_cast %156 : vector<16x16xi32> to vector<1x16x16xi32>
          %cst_70 = arith.constant dense<2147483647> : vector<1xi32>
          %158 = vector.multi_reduction <minsi>, %157, %cst_70 [1, 2] : vector<1x16x16xi32> to vector<1xi32>
          %159 = vector.shape_cast %158 : vector<1xi32> to vector<1x1x1xi32>
          %160 = vector.extract %159[0, 0, 0] : i32 from vector<1x1x1xi32>
          %c16_i32_71 = arith.constant 16 : i32
          %161 = arith.shrsi %160, %c16_i32_71 : i32
          %c65535_i32_72 = arith.constant 65535 : i32
          %162 = arith.andi %160, %c65535_i32_72 : i32
          %163 = arith.index_cast %140 : i32 to index
          %164 = memref.load %arg8[%163] : memref<8xi32, #tpu.memory_space<smem>>
          memref.store %160, %arg8[%163] : memref<8xi32, #tpu.memory_space<smem>>
          %c1_i32_73 = arith.constant 1 : i32
          %165 = arith.addi %140, %c1_i32_73 : i32
          %c0_74 = arith.constant 0 : index
          %166 = memref.load %arg5[%c0_74] : memref<1xi32, #tpu.memory_space<smem>>
          memref.store %165, %arg5[%c0_74] : memref<1xi32, #tpu.memory_space<smem>>
          %167 = vector.broadcast %162 : i32 to vector<16x16xi32>
          %168 = arith.subi %42, %167 : vector<16x16xi32>
          %169 = vector.broadcast %162 : i32 to vector<16x16xi32>
          %170 = arith.subi %42, %169 : vector<16x16xi32>
          %171 = arith.muli %168, %170 : vector<16x16xi32>
          %172 = vector.broadcast %161 : i32 to vector<16x16xi32>
          %173 = arith.subi %41, %172 : vector<16x16xi32>
          %174 = vector.broadcast %161 : i32 to vector<16x16xi32>
          %175 = arith.subi %41, %174 : vector<16x16xi32>
          %176 = arith.muli %173, %175 : vector<16x16xi32>
          %177 = arith.addi %171, %176 : vector<16x16xi32>
          %c49_i32 = arith.constant 49 : i32
          %178 = vector.broadcast %c49_i32 : i32 to vector<16x16xi32>
          %179 = arith.cmpi sgt, %177, %178 : vector<16x16xi32>
          %cst_75 = arith.constant -1.000000e+30 : f32
          %180 = vector.broadcast %cst_75 : f32 to vector<16x16xf32>
          %181 = arith.select %179, %145, %180 : vector<16x16xi1>, vector<16x16xf32>
          %c0_76 = arith.constant 0 : index
          %c0_77 = arith.constant 0 : index
          %182 = vector.load %arg7[%c0_76, %c0_77] : memref<16x16xf32, #tpu.memory_space<vmem>>, vector<16x16xf32>
          tpu.vector_store %arg7[%c0_76, %c0_77], %181 {strides = array<i32>} : memref<16x16xf32, #tpu.memory_space<vmem>>, vector<16x16xf32>,
        } else {
        }
      } else {
      }
    }
    %c8_i32_33 = arith.constant 8 : i32
    %c0_34 = arith.constant 0 : index
    %47 = memref.load %arg5[%c0_34] : memref<1xi32, #tpu.memory_space<smem>>
    %48 = tpu.iota {dimensions = array<i32: 1>} : vector<1x8xi32>
    %c0_i32_35 = arith.constant 0 : i32
    %49 = vector.broadcast %c0_i32_35 : i32 to vector<1x8xi32>
    %c0_i32_36 = arith.constant 0 : i32
    %50 = vector.broadcast %c0_i32_36 : i32 to vector<1x8xi32>
    %51 = arith.cmpi eq, %48, %50 : vector<1x8xi32>
    %c0_37 = arith.constant 0 : index
    %52 = memref.load %arg8[%c0_37] : memref<8xi32, #tpu.memory_space<smem>>
    %53 = vector.broadcast %52 : i32 to vector<1x8xi32>
    %54 = arith.select %51, %53, %49 : vector<1x8xi1>, vector<1x8xi32>
    %c1_i32_38 = arith.constant 1 : i32
    %55 = vector.broadcast %c1_i32_38 : i32 to vector<1x8xi32>
    %56 = arith.cmpi eq, %48, %55 : vector<1x8xi32>
    %c1_39 = arith.constant 1 : index
    %57 = memref.load %arg8[%c1_39] : memref<8xi32, #tpu.memory_space<smem>>
    %58 = vector.broadcast %57 : i32 to vector<1x8xi32>
    %59 = arith.select %56, %58, %54 : vector<1x8xi1>, vector<1x8xi32>
    %c2_i32 = arith.constant 2 : i32
    %60 = vector.broadcast %c2_i32 : i32 to vector<1x8xi32>
    %61 = arith.cmpi eq, %48, %60 : vector<1x8xi32>
    %c2_40 = arith.constant 2 : index
    %62 = memref.load %arg8[%c2_40] : memref<8xi32, #tpu.memory_space<smem>>
    %63 = vector.broadcast %62 : i32 to vector<1x8xi32>
    %64 = arith.select %61, %63, %59 : vector<1x8xi1>, vector<1x8xi32>
    %c3_i32 = arith.constant 3 : i32
    %65 = vector.broadcast %c3_i32 : i32 to vector<1x8xi32>
    %66 = arith.cmpi eq, %48, %65 : vector<1x8xi32>
    %c3_41 = arith.constant 3 : index
    %67 = memref.load %arg8[%c3_41] : memref<8xi32, #tpu.memory_space<smem>>
    %68 = vector.broadcast %67 : i32 to vector<1x8xi32>
    %69 = arith.select %66, %68, %64 : vector<1x8xi1>, vector<1x8xi32>
    %c4_i32 = arith.constant 4 : i32
    %70 = vector.broadcast %c4_i32 : i32 to vector<1x8xi32>
    %71 = arith.cmpi eq, %48, %70 : vector<1x8xi32>
    %c4_42 = arith.constant 4 : index
    %72 = memref.load %arg8[%c4_42] : memref<8xi32, #tpu.memory_space<smem>>
    %73 = vector.broadcast %72 : i32 to vector<1x8xi32>
    %74 = arith.select %71, %73, %69 : vector<1x8xi1>, vector<1x8xi32>
    %c5_i32 = arith.constant 5 : i32
    %75 = vector.broadcast %c5_i32 : i32 to vector<1x8xi32>
    %76 = arith.cmpi eq, %48, %75 : vector<1x8xi32>
    %c5_43 = arith.constant 5 : index
    %77 = memref.load %arg8[%c5_43] : memref<8xi32, #tpu.memory_space<smem>>
    %78 = vector.broadcast %77 : i32 to vector<1x8xi32>
    %79 = arith.select %76, %78, %74 : vector<1x8xi1>, vector<1x8xi32>
    %c6_i32 = arith.constant 6 : i32
    %80 = vector.broadcast %c6_i32 : i32 to vector<1x8xi32>
    %81 = arith.cmpi eq, %48, %80 : vector<1x8xi32>
    %c6_44 = arith.constant 6 : index
    %82 = memref.load %arg8[%c6_44] : memref<8xi32, #tpu.memory_space<smem>>
    %83 = vector.broadcast %82 : i32 to vector<1x8xi32>
    %84 = arith.select %81, %83, %79 : vector<1x8xi1>, vector<1x8xi32>
    %c7_i32 = arith.constant 7 : i32
    %85 = vector.broadcast %c7_i32 : i32 to vector<1x8xi32>
    %86 = arith.cmpi eq, %48, %85 : vector<1x8xi32>
    %c7_45 = arith.constant 7 : index
    %87 = memref.load %arg8[%c7_45] : memref<8xi32, #tpu.memory_space<smem>>
    %88 = vector.broadcast %87 : i32 to vector<1x8xi32>
    %89 = arith.select %86, %88, %84 : vector<1x8xi1>, vector<1x8xi32>
    %c16_i32_46 = arith.constant 16 : i32
    %90 = vector.broadcast %c16_i32_46 : i32 to vector<1x8xi32>
    %91 = arith.shrsi %89, %90 : vector<1x8xi32>
    %c65535_i32 = arith.constant 65535 : i32
    %92 = vector.broadcast %c65535_i32 : i32 to vector<1x8xi32>
    %93 = arith.andi %89, %92 : vector<1x8xi32>
    %c16_i32_47 = arith.constant 16 : i32
    %94 = vector.broadcast %c16_i32_47 : i32 to vector<1x8xi32>
    %95 = arith.muli %91, %94 : vector<1x8xi32>
    %96 = arith.addi %95, %93 : vector<1x8xi32>
    %97 = tpu.iota {dimensions = array<i32: 0>} : vector<256x8xi32>
    %98 = vector.broadcast %96 : vector<1x8xi32> to vector<256x8xi32>
    %99 = arith.cmpi eq, %97, %98 : vector<256x8xi32>
    %100 = arith.extui %99 : vector<256x8xi1> to vector<256x8xi32>
    %101 = arith.sitofp %100 : vector<256x8xi32> to vector<256x8xf32>
    %c0_48 = arith.constant 0 : index
    %c0_49 = arith.constant 0 : index
    %102 = vector.load %arg3[%c0_48, %c0_49] : memref<8x256xf32, #tpu.memory_space<vmem>>, vector<8x256xf32>
    %cst_50 = arith.constant dense<0.000000e+00> : vector<8x8xf32>
    %103 = tpu.matmul %102, %101, %cst_50 {dimension_numbers = #tpu.dot_dimension_numbers<[1], [0], [0], [1], [0, 0, 1, 1], [], []>} : vector<8x256xf32>, vector<256x8xf32>, vector<8x8xf32> -> vector<8x8xf32>
    %104 = arith.sitofp %93 : vector<1x8xi32> to vector<1x8xf32>
    %105 = arith.sitofp %91 : vector<1x8xi32> to vector<1x8xf32>
    %106 = tpu.iota {dimensions = array<i32: 0>} : vector<8x8xi32>
    %c1_i32_51 = arith.constant 1 : i32
    %107 = vector.broadcast %c1_i32_51 : i32 to vector<8x8xi32>
    %108 = arith.andi %106, %107 : vector<8x8xi32>
    %c0_i32_52 = arith.constant 0 : i32
    %109 = vector.broadcast %c0_i32_52 : i32 to vector<8x8xi32>
    %110 = arith.cmpi eq, %108, %109 : vector<8x8xi32>
    %111 = vector.shape_cast %104 : vector<1x8xf32> to vector<1x8xf32>
    %112 = vector.broadcast %111 : vector<1x8xf32> to vector<8x8xf32>
    %113 = vector.shape_cast %105 : vector<1x8xf32> to vector<1x8xf32>
    %114 = vector.broadcast %113 : vector<1x8xf32> to vector<8x8xf32>
    %115 = arith.select %110, %112, %114 : vector<8x8xi1>, vector<8x8xf32>
    %116 = tpu.iota {dimensions = array<i32: 1>} : vector<8x8xi32>
    %117 = vector.broadcast %47 : i32 to vector<8x8xi32>
    %118 = arith.cmpi slt, %116, %117 : vector<8x8xi32>
    %cst_53 = arith.constant 1.600000e+01 : f32
    %119 = vector.broadcast %cst_53 : f32 to vector<8x8xf32>
    %120 = arith.mulf %103, %119 : vector<8x8xf32>
    %121 = arith.addf %120, %115 : vector<8x8xf32>
    %cst_54 = arith.constant 0.000000e+00 : f32
    %122 = vector.broadcast %cst_54 : f32 to vector<8x8xf32>
    %123 = arith.select %118, %121, %122 : vector<8x8xi1>, vector<8x8xf32>
    %c0_55 = arith.constant 0 : index
    %c0_56 = arith.constant 0 : index
    %124 = vector.load %arg6[%c0_55, %c0_56] : memref<8x8xf32, #tpu.memory_space<vmem>>, vector<8x8xf32>
    tpu.vector_store %arg6[%c0_55, %c0_56], %123 {strides = array<i32>} : memref<8x8xf32, #tpu.memory_space<vmem>>, vector<8x8xf32>,
    %125 = tpu.iota {dimensions = array<i32: 0>} : vector<2x8xi32>
    %126 = tpu.iota {dimensions = array<i32: 1>} : vector<2x8xi32>
    %127 = vector.broadcast %47 : i32 to vector<2x8xi32>
    %128 = arith.cmpi slt, %126, %127 : vector<2x8xi32>
    %c0_i32_57 = arith.constant 0 : i32
    %129 = vector.broadcast %c0_i32_57 : i32 to vector<2x8xi32>
    %130 = arith.cmpi eq, %125, %129 : vector<2x8xi32>
    %131 = vector.shape_cast %104 : vector<1x8xf32> to vector<1x8xf32>
    %132 = vector.broadcast %131 : vector<1x8xf32> to vector<2x8xf32>
    %133 = vector.shape_cast %105 : vector<1x8xf32> to vector<1x8xf32>
    %134 = vector.broadcast %133 : vector<1x8xf32> to vector<2x8xf32>
    %135 = arith.select %130, %132, %134 : vector<2x8xi1>, vector<2x8xf32>
    %cst_58 = arith.constant 0.000000e+00 : f32
    %136 = vector.broadcast %cst_58 : f32 to vector<2x8xf32>
    %137 = arith.select %128, %135, %136 : vector<2x8xi1>, vector<2x8xf32>
    %c0_59 = arith.constant 0 : index
    %c0_60 = arith.constant 0 : index
    %138 = vector.load %arg4[%c0_59, %c0_60] : memref<2x8xf32, #tpu.memory_space<vmem>>, vector<2x8xf32>
    tpu.vector_store %arg4[%c0_59, %c0_60], %137 {strides = array<i32>} : memref<2x8xf32, #tpu.memory_space<vmem>>, vector<2x8xf32>,
    return
  }
}

</mosaic_0001>

<bundles_post_ra>
// kernel: tpu_custom_call.1
= control target key start
LH: loop header
LB: loop body
LE: loop exit
PB: predicated region body
PF: predicated region fallthrough
CT: control target
= control target key end

     0   :  { %12 = vsyncpa [#allocation5], 0  ;;  %s1205_s0 = inlined_call_operand.vmem [shape: f32[2,16,16], index: 0, kind: input, shape index: {}]   ;;  %s1206_s1 = inlined_call_operand.vmem [shape: f32[2,9,256], index: 1, kind: input, shape index: {}]   ;;  %s1207_s2 = inlined_call_operand.hbm [shape: f32[1,256], index: 2, kind: output, shape index: {0}]   ;;  %s1208_s3 = inlined_call_operand.hbm [shape: f32[8,256], index: 3, kind: output, shape index: {1}]   ;;  %s1209_s4 = inlined_call_operand.hbm [shape: f32[2,8], index: 4, kind: output, shape index: {2}]   ;;  %s1210_s5 = inlined_call_operand.hbm [shape: s32[1], index: 5, kind: output, shape index: {3}]   ;;  %s1211_s6 = inlined_call_operand.hbm [shape: f32[8,8], index: 6, kind: output, shape index: {4}]  }
   0x1   :  { %13 = vsyncpa [#allocation8], 0 }
   0x2   :  { %14 = vsyncpa [#allocation6], 0 }
   0x3   :  { %15 = vsyncpa [#allocation12], 0  ;;  %v20_v0 = vld [vmem:[%s1206_s1] sm:$0xff]  ;;  %v21_v1 = vld [vmem:[%s1206_s1 + $0x8] sm:$0xff]  ;;  %v60_v2 = vlaneseq  ;;  %vm30_vm0 = vcmask 1040384   ;;  %s861_s16 = smov 0  }
   0x4   :  { %v24_v3 = vld [vmem:[%s1206_s1 + $0x20] sm:$0xff]  ;;  %v25_v4 = vld [vmem:[%s1206_s1 + $0x28] sm:$0xff]  ;;  %v22_v5 = vld [vmem:[%s1206_s1 + $0x10] sm:$0x1]  ;;  %128 = sst [smem:[#allocation3]] %s861_s16  ;;  %vm100_vm1 = vcmask 130048  }
   0x5   :  { %v28_v6 = vadd.f32 %v24_v3, %v20_v0  ;;  %v29_v7 = vadd.f32 %v25_v4, %v21_v1  ;;  %v920_v8 = vshrl.u32 %v60_v2, 7  ;;  %v26_v9 = vld [vmem:[%s1206_s1 + $0x30] sm:$0x1]  ;;  %v23_v10 = vld [vmem:[%s1206_s1 + $0x18] sm:$0x1]  ;;  %v929_v11 = vand.u32 127, %v60_v2 }
   0x6   :  { %v31_v12 = vsel %vm30_vm0, %v22_v5, 0.0  ;;  %v32_v13 = vsel %vm30_vm0, %v26_v9, 0.0  ;;  %v27_v14 = vld [vmem:[%s1206_s1 + $0x38] sm:$0x1]  ;;  %v34_v20 = vsel %vm30_vm0, %v23_v10, 0.0  ;;  %v96_v26 = vld [vmem:[%s1205_s0] sm:$0xff] }
   0x7   :  { %v38_v15 = vmul.f32 0.5, %v28_v6  ;;  %v39_v16 = vmul.f32 0.5, %v29_v7  ;;  %v937_v17 = vadd.s32 8, %v920_v8  ;;  %v150_v18 = vshll.u32 %v920_v8, 16  ;;  %v98_v27 = vld [vmem:[%s1205_s0 + $0x10] sm:$0xff]  ;;  %v97_v30 = vld [vmem:[%s1205_s0 + $0x8] sm:$0xff] }
   0x8   :  { %v33_v19 = vadd.f32 %v32_v13, %v31_v12  ;;  %v35_v21 = vsel %vm30_vm0, %v27_v14, 0.0  ;;  %v99_v31 = vld [vmem:[%s1205_s0 + $0x18] sm:$0xff]  ;;  %130 = sst [smem:[#allocation3 + $0x1]] %s861_s16  ;;  %v101_v36 = vsel %vm100_vm1, %v96_v26, 0.0  ;;  %v102_v37 = vsel %vm100_vm1, %v98_v27, 0.0  ;;  %s980_s0 = smov 0  }
   0x9   :  { %v42_v22 = vsub.f32 0.0, %v38_v15  ;;  %v43_v23 = vsub.f32 0.0, %v39_v16  ;;  %v151_v24 = vshll.u32 %v937_v17, 16  ;;  %v944_v25 = vor.u32 %v150_v18, %v929_v11  ;;  %132 = sst [smem:[#allocation3 + $0x2]] %s861_s16 }
   0xa   :  { %v40_v28 = vmul.f32 0.5, %v33_v19  ;;  %723 = vtanh.f32 %v38_v15  ;;  %v36_v29 = vadd.f32 %v35_v21, %v34_v20  ;;  %134 = sst [smem:[#allocation3 + $0x3]] %s861_s16  ;;  %v103_v38 = vadd.f32 %v102_v37, %v101_v36 }
   0xb   :  { %v44_v32 = vmul.f32 1.442695, %v42_v22  ;;  %v46_v33 = vmul.f32 1.442695, %v43_v23  ;;  %v961_v34 = vor.u32 %v151_v24, %v929_v11  ;;  %725 = vtanh.f32 %v39_v16  ;;  %136 = sst [smem:[#allocation3 + $0x4]] %s861_s16 }
   0xc   :  { %727 = vtanh.f32 %v40_v28  ;;  %v41_v35 = vmul.f32 0.5, %v36_v29  ;;  %v104_v39 = vsel %vm100_vm1, %v97_v30, 0.0  ;;  %v105_v40 = vsel %vm100_vm1, %v99_v31, 0.0  ;;  %138 = sst [smem:[#allocation3 + $0x5]] %s861_s16 }
   0xd   :  { %729 = vpow2.f32 %v44_v32  ;;  %v106_v41 = vadd.f32 %v105_v40, %v104_v39  ;;  %v107_v42 = vmul.f32 0.5, %v103_v38  ;;  %140 = sst [smem:[#allocation3 + $0x6]] %s861_s16  ;;  %vm85_vm2 = vcmask 1046528  }
   0xe   :  { %731 = vpow2.f32 %v46_v33  ;;  %142 = sst [smem:[#allocation3 + $0x7]] %s861_s16  ;;  %v862_v61 = vmov 1966171168   ;;  %vm74_vm3 = vcmp.lt.s32.totalorder %v60_v2, 256 }
   0xf   :  { %733 = vtanh.f32 %v41_v35  ;;  %v108_v43 = vmul.f32 0.5, %v106_v41  ;;  %v109_v44 = vsub.f32 0.0, %v107_v42  ;;  %144 = sst [smem:[#allocation10]] %s861_s16  ;;  %v58_v62 = vunpack.c.l.s4 %v862_v61 }
  0x11   :  { %v110_v45 = vsub.f32 0.0, %v108_v43  ;;  %v111_v46 = vmul.f32 1.442695, %v109_v44  ;;  %v59_v3 = vunpack.c.0.s8 %v58_v62 }
  0x13   :  { %v113_v48 = vmul.f32 1.442695, %v110_v45  ;;  %735 = vpow2.f32 %v111_v46  ;;  %v62_v7 = vsub.s32 %v59_v3, %v920_v8 }
  0x14   :  { %v724_v47 = vpop.eup %723 }
  0x15   :  { %v726_v49 = vpop.eup %725  ;;  %v86_v50 = vrot.slane %v724_v47, 1  ;;  %737 = vpow2.f32 %v113_v48 }
  0x16   :  { %v728_v51 = vpop.eup %727  ;;  %v89_v56 = vrot.slane %v726_v49, 1 }
  0x17   :  { %v730_v52 = vpop.eup %729  ;;  %v87_v53 = vrot.slane %v728_v51, 1 }
  0x18   :  { %v732_v54 = vpop.eup %731  ;;  %v48_v55 = vadd.f32 1.0, %v730_v52 }
  0x19   :  { %v734_v57 = vpop.eup %733  ;;  %v49_v58 = vadd.f32 1.0, %v732_v54  ;;  %v88_v59 = vsel %vm85_vm2, %v86_v50, %v87_v53 }
  0x1a   :  { %739 = vrcp.f32 %v48_v55  ;;  %94 = vst [vmem:[#allocation7] sm:$0xff] %v88_v59  ;;  %v90_v60 = vrot.slane %v734_v57, 1 }
  0x1b   :  { %741 = vrcp.f32 %v49_v58 }
  0x1c   :  { %v91_v63 = vsel %vm85_vm2, %v89_v56, %v90_v60 }
  0x1d   :  { %95 = vst [vmem:[#allocation7 + $0x8] sm:$0xff] %v91_v63  ;;  %v736_v0 = vpop.eup %735 }
  0x1e   :  { %v115_v4 = vadd.f32 1.0, %v736_v0 }
  0x1f   :  { %v738_v1 = vpop.eup %737 }
  0x20   :  { %v116_v5 = vadd.f32 1.0, %v738_v1  ;;  %743 = vrcp.f32 %v115_v4 }
  0x22   :  { %745 = vrcp.f32 %v116_v5 }
  0x24   :  { %v740_v6 = vpop.eup %739 }
  0x25   :  { %v742_v9 = vpop.eup %741 }
  0x26   :  { %v56_v10 = vcombine.low %v740_v6, %v742_v9 }
  0x28   :  { %v63_v12 = vrot.slane %v56_v10, %v62_v7 }
  0x2a   :  { %v70_v13 = vrot.slane %v63_v12, %v62_v7  ;;  %v744_v14 = vpop.eup %743 }
  0x2b   :  { %vm121_vm4 = vcmp.gt.f32.partialorder %v744_v14, 0.8 }
  0x2c   :  { %76 = vst.msk [vmem:[#allocation4] sm:$0x3] %vm74_vm3, %v70_v13  ;;  %v746_v15 = vpop.eup %745  ;;  %v123_v16 = vsel %vm121_vm4, %v744_v14, -1e+30 }
  0x2d   :  { %vm122_vm5 = vcmp.gt.f32.partialorder %v746_v15, 0.8  ;;  %125 = vst.msk [vmem:[#allocation2] sm:$0xff] %vm100_vm1, %v123_v16 }
  0x2e   :  { %v124_v18 = vsel %vm122_vm5, %v746_v15, -1e+30 }
  0x2f   :  { %126 = vst.msk [vmem:[#allocation2 + $0x8] sm:$0xff] %vm100_vm1, %v124_v18 }
  0x30 LB: > { %s160_s21 = sld [smem:[#allocation10]]  ;;  %s859_s0 = sphi %s980_s0, %s159_s0  }
  0x36   : > { %p564_p0 = scmp.ne.s32.totalorder %s160_s21, %s859_s0 }
  0x37   : > { %v986_v2 = vld [vmem:[#allocation2] sm:$0xff] (!%p564_p0)  ;;  %v988_v19 = vld [vmem:[#allocation2 + $0x8] sm:$0xff] (!%p564_p0) }
  0x38   : > { %164 = sbr.rel (%p564_p0) target bundleno = 638 (0x27e), region = 20  ;;  %v167_v20 = vsel (!%p564_p0), %vm100_vm1, %v986_v2, -inf  ;;  %v168_v21 = vsel (!%p564_p0), %vm100_vm1, %v988_v19, -inf }
  0x39   : > { %v169_v22 = vmax.f32 (!%p564_p0), %v167_v20, %v168_v21 }
  0x3b   : > { %170 = vmax.xlane.f32.xlu0 (!%p564_p0), %v169_v22 }
  0xc8   : > { %v171_v23 = vpop.xlane.xlu0 %170 }
  0xc9   : > { %v172_v24 = vrot.slane %v171_v23, 4 }
  0xcb   : > { %v173_v26 = vmax.f32 %v171_v23, %v172_v24 }
  0xcd   : > { %v174_v27 = vrot.slane %v173_v26, 2 }
  0xcf   : > { %v175_v28 = vmax.f32 %v173_v26, %v174_v27 }
  0xd1   : > { %v176_v29 = vrot.slane %v175_v28, 1 }
  0xd3   : > { %v177_v30 = vmax.f32 %v175_v28, %v176_v29 }
  0xd5   : > { %703 = vpush %v177_v30 }
 0x106   : > { %s704_s22 = spop %703 }
 0x107   : > { %p179_p1 = scmp.gt.f32.partialorder %s704_s22, 0.8 }
 0x108   : > { %v183_v31 = vstv (%p179_p1), %s704_s22  ;;  %s220_s23 = sadd.s32 (%p179_p1), 1, %s859_s0  ;;  %s218_s27 = scalar_lea.smem (%p179_p1), [#allocation3], %s859_s0 }
 0x109   : > { %182 = sbr.rel (!%p179_p1) target bundleno = 638 (0x27e), region = 24  ;;  %vm184_vm6 = vcmp.ge.f32.partialorder (%p179_p1), %v986_v2, %v183_v31  ;;  %vm185_vm7 = vcmp.ge.f32.partialorder (%p179_p1), %v988_v19, %v183_v31  ;;  %221 = sst [smem:[#allocation10]] (%p179_p1), %s220_s23 }
 0x10a   : > { %v186_v32 = vsel (%p179_p1), %vm184_vm6, %v944_v25, 2147483647  ;;  %v187_v33 = vsel (%p179_p1), %vm185_vm7, %v961_v34, 2147483647 }
 0x10b   : > { %v188_v35 = vsel (%p179_p1), %vm100_vm1, %v186_v32, 2147483647  ;;  %v189_v36 = vsel (%p179_p1), %vm100_vm1, %v187_v33, 2147483647 }
 0x10c   : > { %vm190_vm8 = vcmp.lt.s32.totalorder (%p179_p1), %v188_v35, %v189_v36 }
 0x10d   : > { %v191_v37 = vsel (%p179_p1), %vm190_vm8, %v188_v35, %v189_v36 }
 0x10e   : > { %v193_v38 = vshra.s32 (%p179_p1), %v191_v37, 16  ;;  %v192_v40 = vand.u32 (%p179_p1), 65535, %v191_v37 }
 0x110   : > { %v195_v39 = vcvt.s32.f32 %v193_v38  ;;  %v194_v41 = vcvt.s32.f32 %v192_v40 }
 0x112   : > { %196 = vmin.xlane.f32.xlu0 %v195_v39 }
 0x19f   : > { %v197_v42 = vpop.xlane.xlu0 %196 }
 0x1a0   : > { %vm198_vm9 = vcmp.eq.f32.partialorder %v195_v39, %v197_v42  ;;  %v203_v44 = vcvt.f32.s32 %v197_v42 }
 0x1a1   : > { %v199_v43 = vsel %vm198_vm9, %v194_v41, inf }
 0x1a2   : > { %200 = vmin.xlane.f32.xlu0 %v199_v43  ;;  %v204_v46 = vshll.u32 %v203_v44, 16 }
 0x22f   : > { %v201_v45 = vpop.xlane.xlu0 %200 }
 0x230   : > { %v202_v47 = vcvt.f32.s32 %v201_v45 }
 0x232   : > { %v205_v48 = vadd.s32 %v204_v46, %v202_v47 }
 0x234   : > { %v206_v49 = vrot.slane %v205_v48, 4 }
 0x236   : > { %vm207_vm10 = vcmp.lt.s32.totalorder %v205_v48, %v206_v49 }
 0x237   : > { %v208_v50 = vsel %vm207_vm10, %v205_v48, %v206_v49 }
 0x238   : > { %v209_v51 = vrot.slane %v208_v50, 2 }
 0x23a   : > { %vm210_vm11 = vcmp.lt.s32.totalorder %v208_v50, %v209_v51 }
 0x23b   : > { %v211_v52 = vsel %vm210_vm11, %v208_v50, %v209_v51 }
 0x23c   : > { %v212_v53 = vrot.slane %v211_v52, 1 }
 0x23e   : > { %vm213_vm12 = vcmp.lt.s32.totalorder %v211_v52, %v212_v53 }
 0x23f   : > { %v214_v54 = vsel %vm213_vm12, %v211_v52, %v212_v53 }
 0x240   : > { %705 = vpush %v214_v54 }
 0x271   : > { %s706_s24 = spop %705 }
 0x272   : > { %s216_s25 = sshra.s32 %s706_s24, 16  ;;  %s217_s26 = sand.u32 65535, %s706_s24 }
 0x273   : > { %219 = sst [smem:[%s218_s27]] %s706_s24  ;;  %v222_v55 = vstv %s217_s26  ;;  %v225_v56 = vstv %s216_s25 }
 0x274   : > { %v223_v57 = vsub.s32 %v929_v11, %v222_v55  ;;  %v226_v58 = vsub.s32 %v920_v8, %v225_v56  ;;  %v227_v59 = vsub.s32 %v937_v17, %v225_v56 }
 0x276   : > { %v224_v60 = vmul.u32 %v223_v57, %v223_v57  ;;  %v228_v61 = vmul.u32 %v226_v58, %v226_v58 }
 0x277   : > { %v229_v62 = vmul.u32 %v227_v59, %v227_v59 }
 0x278   : > { %v230_v63 = vadd.s32 %v228_v61, %v224_v60 }
 0x279   : > { %v231_v0 = vadd.s32 %v229_v62, %v224_v60 }
 0x27a   : > { %vm232_vm13 = vcmp.gt.s32.totalorder %v230_v63, 49 }
 0x27b   : > { %vm233_vm14 = vcmp.gt.s32.totalorder %v231_v0, 49  ;;  %v234_v1 = vsel %vm232_vm13, %v986_v2, -1e+30 }
 0x27c   : > { %v235_v3 = vsel %vm233_vm14, %v988_v19, -1e+30  ;;  %236 = vst.msk [vmem:[#allocation2] sm:$0xff] %vm100_vm1, %v234_v1 }
 0x27d   : > { %237 = vst.msk [vmem:[#allocation2 + $0x8] sm:$0xff] %vm100_vm1, %v235_v3 }
 0x27e PF: > { %s159_s0 = sadd.s32 1, %s859_s0  }
 0x27f   : > { %p156_p2 = scmp.ge.s32.totalorder %s159_s0, 8  }
 0x280   :  { %s240_s28 = sld [smem:[#allocation3]] (%p156_p2)  ;;  %s565_s29 = sld [smem:[#allocation3 + $0x1]] (%p156_p2)  ;;  %vm239_vm15 = vcmp.eq.s32.totalorder (%p156_p2), %v929_v11, 0  ;;  %v402_v4 = vld [vmem:[#allocation7 + $0x8] sm:$0xff] (%p156_p2)  ;;  %vm243_vm0 = vcmp.eq.s32.totalorder (%p156_p2), %v929_v11, 1  ;;  %vm247_vm2 = vcmp.eq.s32.totalorder (%p156_p2), %v929_v11, 2 }
 0x281   :  { %158 = sbr.rel (!%p156_p2) target bundleno = 48 (0x30), region = 85  ;;  %s566_s30 = sld [smem:[#allocation3 + $0x2]] (%p156_p2)  ;;  %467 = vmatprep.mubr.f32.mxu0 (%p156_p2), %v402_v4  ;;  %vm251_vm1 = vcmp.eq.s32.totalorder (%p156_p2), %v929_v11, 3  ;;  %vm255_vm3 = vcmp.eq.s32.totalorder (%p156_p2), %v929_v11, 4  ;;  %vm259_vm4 = vcmp.eq.s32.totalorder (%p156_p2), %v929_v11, 5  ;;  %vm263_vm5 = vcmp.eq.s32.totalorder (%p156_p2), %v929_v11, 6 }
 0x282   :  { %s567_s7 = sld [smem:[#allocation3 + $0x3]] (%p156_p2)  ;;  %s568_s8 = sld [smem:[#allocation3 + $0x4]] (%p156_p2)  ;;  %vm267_vm6 = vcmp.eq.s32.totalorder (%p156_p2), %v929_v11, 7  ;;  %v289_v24 = vadd.s32 (%p156_p2), 128, %v920_v8  ;;  %v290_v26 = vadd.s32 (%p156_p2), 136, %v920_v8  ;;  %v291_v27 = vadd.s32 (%p156_p2), 144, %v920_v8 }
 0x283   :  { %s569_s9 = sld [smem:[#allocation3 + $0x5]] (%p156_p2)  ;;  %s570_s10 = sld [smem:[#allocation3 + $0x6]] (%p156_p2)  ;;  %v292_v28 = vadd.s32 (%p156_p2), 152, %v920_v8  ;;  %v275_v29 = vadd.s32 (%p156_p2), 16, %v920_v8  ;;  %v276_v30 = vadd.s32 (%p156_p2), 24, %v920_v8  ;;  %v293_v32 = vadd.s32 (%p156_p2), 160, %v920_v8 }
 0x284   :  { %s571_s11 = sld [smem:[#allocation3 + $0x7]] (%p156_p2)  ;;  %v294_v33 = vadd.s32 (%p156_p2), 168, %v920_v8  ;;  %v277_v35 = vadd.s32 (%p156_p2), 32, %v920_v8  ;;  %v278_v36 = vadd.s32 (%p156_p2), 40, %v920_v8  ;;  %v863_v37 = vmov (%p156_p2), 1.0|1.0  }
 0x285   :  { %v295_v38 = vadd.s32 (%p156_p2), 176, %v920_v8  ;;  %v279_v39 = vadd.s32 (%p156_p2), 48, %v920_v8  ;;  %v280_v40 = vadd.s32 (%p156_p2), 56, %v920_v8  ;;  %v297_v41 = vadd.s32 (%p156_p2), 192, %v920_v8  ;;  %v401_v57 = vld [vmem:[#allocation7] sm:$0xff] (%p156_p2)  ;;  %s238_s12 = sld [smem:[#allocation10]] (%p156_p2) }
 0x286   :  { %v241_v5 = vstv (%p156_p2), %s240_s28  ;;  %v245_v6 = vstv (%p156_p2), %s565_s29  ;;  %v298_v42 = vadd.s32 (%p156_p2), 200, %v920_v8  ;;  %v281_v43 = vadd.s32 (%p156_p2), 64, %v920_v8  ;;  %s864_s1 = smov (%p156_p2), [#allocation7]   ;;  %s865_s14 = smov (%p156_p2), [#allocation4]  }
 0x287   :  { %v242_v7 = vsel (%p156_p2), %vm239_vm15, %v241_v5, 0  ;;  %v249_v9 = vstv (%p156_p2), %s566_s30  ;;  %v282_v44 = vadd.s32 (%p156_p2), 72, %v920_v8  ;;  %v299_v45 = vadd.s32 (%p156_p2), 208, %v920_v8  ;;  %s506_s13 = sshll.u32 (%p156_p2), %s864_s1, 4  ;;  %s496_s15 = sshll.u32 (%p156_p2), %s865_s14, 4  ;;  %s507_s13 = int_to_ptr.vmem [resolvable:$true] %s506_s13  ;;  %s497_s15 = int_to_ptr.vmem [resolvable:$true] %s496_s15 }
 0x288   :  { %v253_v25 = vstv %s567_s7  ;;  %v246_v34 = vsel %vm243_vm0, %v245_v6, %v242_v7  ;;  %v257_v10 = vstv %s568_s8  ;;  %v300_v46 = vadd.s32 216, %v920_v8  ;;  %s747_s16 = scalar_lea.vmem %s507_s13, 256  ;;  %p752_p4 = scmp.lt.s32.totalorder %s507_s13, %s507_s13 }
 0x289   :  { %v250_v12 = vsel %vm247_vm2, %v249_v9, %v246_v34  ;;  %v261_v13 = vstv %s569_s9  ;;  %v265_v15 = vstv %s570_s10  ;;  %v283_v47 = vadd.s32 80, %v920_v8  ;;  %p748_p3 = scmp.ne.s32.totalorder %s507_s13, %s747_s16  ;;  %p753_p5 = scmp.lt.s32.totalorder %s747_s16, %s747_s16 }
 0x28a   :  { %v254_v14 = vsel %vm251_vm1, %v253_v25, %v250_v12  ;;  %v269_v18 = vstv %s571_s11  ;;  %v284_v48 = vadd.s32 88, %v920_v8  ;;  %v301_v49 = vadd.s32 224, %v920_v8 }
 0x28b   :  { %v258_v16 = vsel %vm255_vm3, %v257_v10, %v254_v14  ;;  %v302_v50 = vadd.s32 232, %v920_v8  ;;  %v285_v51 = vadd.s32 96, %v920_v8  ;;  %v286_v52 = vadd.s32 104, %v920_v8  ;;  %p754_p6 = por %p753_p5, %p752_p4 }
 0x28c   :  { %v262_v2 = vsel %vm259_vm4, %v261_v13, %v258_v16  ;;  %v303_v53 = vadd.s32 240, %v920_v8  ;;  %v304_v54 = vadd.s32 248, %v920_v8  ;;  %v287_v55 = vadd.s32 112, %v920_v8 }
 0x28d   :  { %v266_v19 = vsel %vm263_vm5, %v265_v15, %v262_v2  ;;  %v288_v56 = vadd.s32 120, %v920_v8  ;;  %v475_v60 = vand.u32 1, %v920_v8  ;;  %v478_v63 = vstv %s238_s12  ;;  %p755_p7 = pnand %p754_p6, %p748_p3 }
 0x28e   :  { %v1020_v20 = vsel %vm267_vm6, %v269_v18, %v266_v19 }
 0x28f   :  { %v271_v21 = vshra.s32 %v1020_v20, 16  ;;  %v272_v22 = vand.u32 65535, %v1020_v20 }
 0x291   :  { %v273_v23 = vmul.u32 16, %v271_v21  ;;  %v1112_v58 = vcvt.s32.f32 %v272_v22  ;;  %v1116_v59 = vcvt.s32.f32 %v271_v21 }
 0x293   :  { %v1034_v31 = vadd.s32 %v273_v23, %v272_v22 }
 0x295   :  { %vm321_vm7 = vcmp.eq.s32.totalorder %v289_v24, %v1034_v31  ;;  %vm322_vm8 = vcmp.eq.s32.totalorder %v290_v26, %v1034_v31  ;;  %vm305_vm9 = vcmp.eq.s32.totalorder %v920_v8, %v1034_v31  ;;  %vm306_vm10 = vcmp.eq.s32.totalorder %v937_v17, %v1034_v31 }
 0x296   :  { %vm671_vm11 = vmpackc.low %vm322_vm8, %vm321_vm7  ;;  %vm323_vm12 = vcmp.eq.s32.totalorder %v291_v27, %v1034_v31  ;;  %vm324_vm13 = vcmp.eq.s32.totalorder %v292_v28, %v1034_v31  ;;  %vm307_vm14 = vcmp.eq.s32.totalorder %v275_v29, %v1034_v31  ;;  %vm308_vm15 = vcmp.eq.s32.totalorder %v276_v30, %v1034_v31 }
 0x297   :  { %672 = vmatprep.subr.msk.bf16.mxu0 %vm671_vm11, %v863_v37  ;;  %vm673_vm0 = vmpackc.low %vm306_vm10, %vm305_vm9  ;;  %vm325_vm2 = vcmp.eq.s32.totalorder %v293_v32, %v1034_v31  ;;  %vm326_vm1 = vcmp.eq.s32.totalorder %v294_v33, %v1034_v31  ;;  %v296_v17 = vadd.s32 184, %v920_v8  ;;  %vm309_vm6 = vcmp.eq.s32.totalorder %v277_v35, %v1034_v31 }
 0x298   :  { %674 = vmatpush3.bf16.msk.msra.mxu0 %vm673_vm0, %v863_v37  ;;  %vm675_vm3 = vmpackc.low %vm324_vm13, %vm323_vm12  ;;  %vm310_vm7 = vcmp.eq.s32.totalorder %v278_v36, %v1034_v31  ;;  %vm327_vm8 = vcmp.eq.s32.totalorder %v295_v38, %v1034_v31  ;;  %vm311_vm12 = vcmp.eq.s32.totalorder %v279_v39, %v1034_v31  ;;  %vm312_vm13 = vcmp.eq.s32.totalorder %v280_v40, %v1034_v31 }
 0x299   :  { %676 = vmatprep.subr.msk.bf16.mxu0 %vm675_vm3, %v863_v37  ;;  %vm677_vm4 = vmpackc.low %vm308_vm15, %vm307_vm14  ;;  %vm328_vm9 = vcmp.eq.s32.totalorder %v296_v17, %v1034_v31  ;;  %vm329_vm14 = vcmp.eq.s32.totalorder %v297_v41, %v1034_v31  ;;  %vm330_vm15 = vcmp.eq.s32.totalorder %v298_v42, %v1034_v31  ;;  %vm314_vm3 = vcmp.eq.s32.totalorder %v282_v44, %v1034_v31 }
 0x29a   :  { %vm679_vm5 = vmpackc.low %vm326_vm1, %vm325_vm2  ;;  %vm313_vm1 = vcmp.eq.s32.totalorder %v281_v43, %v1034_v31 }
 0x29b   :  { %vm681_vm10 = vmpackc.low %vm310_vm7, %vm309_vm6 }
 0x29c   :  { %678 = vmatpush3.bf16.msk.msra.mxu0 %vm677_vm4, %v863_v37  ;;  %vm683_vm11 = vmpackc.low %vm328_vm9, %vm327_vm8  ;;  %vm331_vm4 = vcmp.eq.s32.totalorder %v299_v45, %v1034_v31  ;;  %vm315_vm8 = vcmp.eq.s32.totalorder %v283_v47, %v1034_v31  ;;  %vm316_vm9 = vcmp.eq.s32.totalorder %v284_v48, %v1034_v31 }
 0x29d   :  { %680 = vmatprep.subr.msk.bf16.mxu0 %vm679_vm5, %v863_v37  ;;  %vm685_vm0 = vmpackc.low %vm312_vm13, %vm311_vm12  ;;  %vm332_vm5 = vcmp.eq.s32.totalorder %v300_v46, %v1034_v31 }
 0x29e   :  { %vm687_vm2 = vmpackc.low %vm330_vm15, %vm329_vm14  ;;  %vm317_vm14 = vcmp.eq.s32.totalorder %v285_v51, %v1034_v31  ;;  %vm318_vm15 = vcmp.eq.s32.totalorder %v286_v52, %v1034_v31 }
 0x29f   :  { %vm689_vm6 = vmpackc.low %vm314_vm3, %vm313_vm1 }
 0x2a0   :  { %682 = vmatpush3.bf16.msk.msra.mxu0 %vm681_vm10, %v863_v37  ;;  %vm691_vm7 = vmpackc.low %vm332_vm5, %vm331_vm4  ;;  %vm333_vm10 = vcmp.eq.s32.totalorder %v301_v49, %v1034_v31  ;;  %vm319_vm4 = vcmp.eq.s32.totalorder %v287_v55, %v1034_v31  ;;  %vm320_vm5 = vcmp.eq.s32.totalorder %v288_v56, %v1034_v31 }
 0x2a1   :  { %684 = vmatprep.subr.msk.bf16.mxu0 %vm683_vm11, %v863_v37  ;;  %vm334_vm11 = vcmp.eq.s32.totalorder %v302_v50, %v1034_v31  ;;  %vm693_vm12 = vmpackc.low %vm316_vm9, %vm315_vm8  ;;  %vm485_vm8 = vcmp.eq.s32.totalorder %v920_v8, 0  ;;  %vm488_vm9 = vcmask 58368  }
 0x2a2   :  { %vm695_vm13 = vmpackc.low %vm334_vm11, %vm333_vm10  ;;  %vm1129_vm10 = vcmp.lt.s32.totalorder %v929_v11, %v478_v63  ;;  %v486_v1 = vsel %vm485_vm8, %v1112_v58, %v1116_v59 }
 0x2a3   :  { %vm697_vm1 = vmpackc.low %vm318_vm15, %vm317_vm14  ;;  %v487_v3 = vsel %vm1129_vm10, %v486_v1, 0.0 }
 0x2a4   :  { %686 = vmatpush3.bf16.msk.msra.mxu0 %vm685_vm0, %v863_v37  ;;  %vm335_vm0 = vcmp.eq.s32.totalorder %v303_v53, %v1034_v31 }
 0x2a5   :  { %688 = vmatprep.subr.msk.bf16.mxu0 %vm687_vm2, %v863_v37  ;;  %vm336_vm2 = vcmp.eq.s32.totalorder %v304_v54, %v1034_v31 }
 0x2a6   :  { %vm699_vm3 = vmpackc.low %vm336_vm2, %vm335_vm0 }
 0x2a8   :  { %690 = vmatpush3.bf16.msk.msra.mxu0 %vm689_vm6, %v863_v37  ;;  %vm701_vm6 = vmpackc.low %vm320_vm5, %vm319_vm4 }
 0x2a9   :  { %692 = vmatprep.subr.msk.bf16.mxu0 %vm691_vm7, %v863_v37  ;;  %vm1119_vm7 = vcmp.eq.s32.totalorder %v475_v60, 0 }
 0x2aa   :  { %v477_v62 = vsel %vm1119_vm7, %v1112_v58, %v1116_v59 }
 0x2ac   :  { %694 = vmatpush3.bf16.msk.msra.mxu0 %vm693_vm12, %v863_v37 }
 0x2ad   :  { %696 = vmatprep.subr.msk.bf16.mxu0 %vm695_vm13, %v863_v37 }
 0x2b0   :  { %698 = vmatpush3.bf16.msk.msra.mxu0 %vm697_vm1, %v863_v37 }
 0x2b1   :  { %700 = vmatprep.subr.msk.bf16.mxu0 %vm699_vm3, %v863_v37 }
 0x2b4   :  { %702 = vmatpush3.bf16.msk.msra.mxu0 %vm701_vm6, %v863_v37 }
 0x2b7   :  { %468 = vmatmul.mubr.f32.vlgmr.msra.gmra.mrb[0].mxu0 %v401_v57 }
 0x2b8   :  { %758 = shalt.err (!%p755_p7)
}
 0x2b9   :  { %s759_s19 = scalar_lea.hbm %s1208_s3, 256 }
 0x2ba   :  { %p760_p8 = scmp.ne.s32.totalorder %s1208_s3, %s759_s19  ;;  %p763_p9 = scmp.lt.u32.totalorder %s759_s19, %s1208_s3 }
 0x2bc   :  { %p765_p10 = pnand %p763_p9, %p760_p8 }
 0x2be   :  { %768 = shalt.err (!%p765_p10)
}
 0x2bf   :  { %509 = dma.vmem_to_hbm [thread:$0]  %s507_s13, 256, %s1208_s3, [#allocation8]   ;;  %489 = vst.msk [vmem:[#allocation9] sm:$0x3] %vm488_vm9, %v487_v3 }
 0x2c0   :  { %s769_s25 = scalar_lea.vmem %s497_s15, 32  ;;  %p774_p12 = scmp.lt.s32.totalorder %s497_s15, %s497_s15 }
 0x2c1   :  { %p770_p11 = scmp.ne.s32.totalorder %s497_s15, %s769_s25  ;;  %p775_p13 = scmp.lt.s32.totalorder %s769_s25, %s769_s25 }
 0x2c3   :  { %p776_p0 = por %p775_p13, %p774_p12 }
 0x2c5   :  { %p777_p1 = pnand %p776_p0, %p770_p11 }
 0x2c7   :  { %780 = shalt.err (!%p777_p1)
}
 0x2c8   :  { %s781_s28 = scalar_lea.hbm %s1207_s2, 32 }
 0x2c9   :  { %p782_p2 = scmp.ne.s32.totalorder %s1207_s2, %s781_s28  ;;  %p785_p3 = scmp.lt.u32.totalorder %s781_s28, %s1207_s2 }
 0x2cb   :  { %p787_p4 = pnand %p785_p3, %p782_p2 }
 0x2cd   :  { %790 = shalt.err (!%p787_p4)
}
 0x2ce   :  { %499 = dma.vmem_to_hbm [thread:$0]  %s497_s15, 32, %s1207_s2, [#allocation5]  }
 0x2cf   :  { %s866_s10 = smov [#allocation9]  }
 0x2d0   :  { %s516_s11 = sshll.u32 %s866_s10, 4  ;;  %s517_s11 = int_to_ptr.vmem [resolvable:$true] %s516_s11 }
 0x2d1   :  { %s791_s12 = scalar_lea.vmem %s517_s11, 32  ;;  %p796_p6 = scmp.lt.s32.totalorder %s517_s11, %s517_s11 }
 0x2d2   :  { %p792_p5 = scmp.ne.s32.totalorder %s517_s11, %s791_s12  ;;  %p797_p7 = scmp.lt.s32.totalorder %s791_s12, %s791_s12 }
 0x2d4   :  { %p798_p8 = por %p797_p7, %p796_p6 }
 0x2d6   :  { %p799_p9 = pnand %p798_p8, %p792_p5 }
 0x2d8   :  { %802 = shalt.err (!%p799_p9)
}
 0x2d9   :  { %s803_s14 = scalar_lea.hbm %s1209_s4, 32 }
 0x2da   :  { %p804_p10 = scmp.ne.s32.totalorder %s1209_s4, %s803_s14  ;;  %p807_p11 = scmp.lt.u32.totalorder %s803_s14, %s1209_s4 }
 0x2dc   :  { %p809_p12 = pnand %p807_p11, %p804_p10 }
 0x2de   :  { %812 = shalt.err (!%p809_p12)
}
 0x2df   :  { %519 = dma.vmem_to_hbm [thread:$0]  %s517_s11, 32, %s1209_s4, [#allocation8]  }
 0x2e0   :  { %s813_s21 = scalar_lea.hbm %s1210_s5, 16 }
 0x2e1   :  { %p814_p13 = scmp.ne.s32.totalorder %s1210_s5, %s813_s21  ;;  %p817_p0 = scmp.lt.u32.totalorder %s813_s21, %s1210_s5 }
 0x2e3   :  { %p819_p1 = pnand %p817_p0, %p814_p13 }
 0x2e5   :  { %822 = shalt.err (!%p819_p1)
}
 0x2e6   :  { %s867_s26 = smov [#allocation10]   ;;  %s868_s4 = smov [#allocation11]   ;;  %vm483_vm11 = vcmask 64512  }
 0x2e7   :  { %527 = dma.smem_to_hbm %s867_s26, 16, %s1210_s5, [#allocation6]  }
 0x2e8   :  { %s534_s29 = sshll.u32 %s868_s4, 4  ;;  %s535_s29 = int_to_ptr.vmem [resolvable:$true] %s534_s29 }
 0x2e9   :  { %s823_s30 = scalar_lea.vmem %s535_s29, 128  ;;  %p828_p3 = scmp.lt.s32.totalorder %s535_s29, %s535_s29 }
 0x2ea   :  { %p824_p2 = scmp.ne.s32.totalorder %s535_s29, %s823_s30  ;;  %p829_p4 = scmp.lt.s32.totalorder %s823_s30, %s823_s30 }
 0x2ec   :  { %p830_p5 = por %p829_p4, %p828_p3 }
 0x2ee   :  { %p831_p6 = pnand %p830_p5, %p824_p2 }
 0x38a   :  { %v668_v8 = vpop.f32.mrb[0].mxu0 }
 0x38b   :  { %v669_v11 = vpop.f32.mrb[1].mxu0 }
 0x38c   :  { %v670_v4 = vadd.f32 %v669_v11, %v668_v8 }
 0x38e   :  { %v480_v5 = vmul.f32 16.0, %v670_v4 }
 0x390   :  { %v481_v6 = vadd.f32 %v480_v5, %v477_v62 }
 0x392   :  { %v482_v7 = vsel %vm1129_vm10, %v481_v6, 0.0 }
 0x393   :  { %484 = vst.msk [vmem:[#allocation11] sm:$0xff] %vm483_vm11, %v482_v7 }
 0x394   :  { %834 = shalt.err (!%p831_p6)
}
 0x395   :  { %s835_s8 = scalar_lea.hbm %s1211_s6, 128 }
 0x396   :  { %p836_p7 = scmp.ne.s32.totalorder %s1211_s6, %s835_s8  ;;  %p839_p8 = scmp.lt.u32.totalorder %s835_s8, %s1211_s6 }
 0x398   :  { %p841_p9 = pnand %p839_p8, %p836_p7 }
 0x39a   :  { %844 = shalt.err (!%p841_p9)
}
 0x39b   :  { %537 = dma.vmem_to_hbm [thread:$0]  %s535_s29, 128, %s1211_s6, [#allocation12]  }
 0x39c   :  { %849 = dma.done.wait [#allocation5], 32  }
 0x39d   :  { %850 = vsyncadd [#allocation5], 4294967264 }
 0x39e   :  { %851 = dma.done.wait [#allocation8], 288  }
 0x39f   :  { %852 = vsyncadd [#allocation8], 4294967008 }
 0x3a0   :  { %853 = dma.done.wait [#allocation6], 16  }
 0x3a1   :  { %854 = vsyncadd [#allocation6], 4294967280 }
 0x3a2   :  { %855 = dma.done.wait [#allocation12], 128  }
 0x3a3   :  { %856 = vsyncadd [#allocation12], 4294967168 }
 0x3a4   :  { %553 = sfence }
 0x3a5   :  { %554 = vsyncpa [#allocation5], 1 }
 0x3a6   :  { %555 = vsyncpa [#allocation8], 1 }
 0x3a7   :  { %556 = vsyncpa [#allocation12], 1 }
 0x3a8   :  { %557 = vsyncpa [#allocation6], 1 }

</bundles_post_ra>
